<compile_context>
chip_gen: v6e
topology: v6e:2x2x1
jax: 0.10.0
libtpu: 0.0.40
codegen_flags: <defaults>
</compile_context>

<pallas_src>
import functools

import jax
import jax.numpy as jnp
from jax.experimental import pallas as pl
from jax.experimental.pallas import tpu as pltpu

_LANE = 128
_SUBLANE = 8


def _round_up(n, m):
    return (n + m - 1) // m * m


def _pad_to(a, shape):
    return jnp.pad(a, [(0, t - s) for s, t in zip(a.shape, shape)])


# ----------------------------- kernel -------------------------------------- #

def _dqn_fused_kernel(x_ref, w1_ref, b1_ref, w2_ref, b2_ref, o_ref):
    # Layer 1: (TB, IN) @ (IN, HID_PAD) on the MXU, f32 accumulate.
    h = jnp.dot(x_ref[...], w1_ref[...], preferred_element_type=jnp.float32)
    h = jnp.maximum(h + b1_ref[...], 0.0)                 # bias + ReLU in f32
    # Layer 2 (plain fc2, or folded dueling head): (TB, HID_PAD) @ (HID_PAD, ACT_PAD).
    out = jnp.dot(h.astype(w2_ref.dtype), w2_ref[...],
                  preferred_element_type=jnp.float32) + b2_ref[...]
    o_ref[...] = out.astype(o_ref.dtype)


# ----------------------------- wrapper -------------------------------------- #

def fold_dueling_params(params):
    """Fold `val + adv - mean(adv)` into one (hid, act) weight and (1, act) bias.

    Exact identity: the dueling combine is linear in the hidden activations.
    Done once per weight update (wrapper-side), not per forward inside the kernel.
    """
    wa, ba = params["wa"], params["ba"]          # (hid, act), (1, act)
    wv, bv = params["wv"], params["bv"]          # (hid, 1),   (1, 1)
    w_eff = wa - jnp.mean(wa, axis=1, keepdims=True) + wv
    b_eff = ba - jnp.mean(ba, axis=1, keepdims=True) + bv
    return w_eff, b_eff


@functools.partial(jax.jit, static_argnames=("dueling", "compute_dtype", "tb"))
def dqn_forward(x, params, *, dueling, compute_dtype=jnp.bfloat16, tb=256):
    """Pallas forward for DQNetworkFC.  x: (B, in_channels) f32."""
    B, in_dim = x.shape
    hid = params["w1"].shape[1]

    if dueling:
        w2, b2 = fold_dueling_params(params)
    else:
        w2, b2 = params["w2"], params["b2"]
    act = w2.shape[1]

    # Lane-dense padding (hidden & output widths -> 128), batch -> tile multiple.
    hid_p = _round_up(hid, _LANE)
    act_p = _round_up(act, _LANE)
    TB = min(tb, _round_up(B, _SUBLANE))          # always a multiple of 8
    B_p = _round_up(B, TB)

    w1 = _pad_to(params["w1"], (in_dim, hid_p)).astype(compute_dtype)
    b1 = _pad_to(params["b1"], (1, hid_p)).astype(jnp.float32)
    w2 = _pad_to(w2, (hid_p, act_p)).astype(compute_dtype)
    b2 = _pad_to(b2, (1, act_p)).astype(jnp.float32)
    xp = _pad_to(x, (B_p, in_dim)).astype(compute_dtype)

    out = pl.pallas_call(
        _dqn_fused_kernel,
        out_shape=jax.ShapeDtypeStruct((B_p, act_p), jnp.float32),
        grid_spec=pltpu.PrefetchScalarGridSpec(
            num_scalar_prefetch=0,
            grid=(B_p // TB,),
            in_specs=[
                pl.BlockSpec((TB, in_dim), lambda i: (i, 0)),     # x tile
                pl.BlockSpec((in_dim, hid_p), lambda i: (0, 0)),  # w1 (resident)
                pl.BlockSpec((1, hid_p), lambda i: (0, 0)),       # b1
                pl.BlockSpec((hid_p, act_p), lambda i: (0, 0)),   # w2 (resident)
                pl.BlockSpec((1, act_p), lambda i: (0, 0)),       # b2
            ],
            out_specs=pl.BlockSpec((TB, act_p), lambda i: (i, 0)),
        ),
        compiler_params=pltpu.CompilerParams(
            dimension_semantics=("parallel",)),
    )(xp, w1, b1, w2, b2)

    return out[:B, :act]


# ------------------------- parameter construction -------------------------- #

def init_params(key, in_channels, act_dim, dueling, hid_dim=64):
    """Deterministic init mimicking PyTorch nn.Linear U(-1/sqrt(fan_in), ...)."""
    def linear(k, fan_in, fan_out):
        kw, kb = jax.random.split(k)
        bound = 1.0 / jnp.sqrt(fan_in)
        w = jax.random.uniform(kw, (fan_in, fan_out), jnp.float32, -bound, bound)
        b = jax.random.uniform(kb, (1, fan_out), jnp.float32, -bound, bound)
        return w, b

    k1, k2, k3 = jax.random.split(key, 3)
    params = {}
    params["w1"], params["b1"] = linear(k1, in_channels, hid_dim)
    if dueling:
        params["wa"], params["ba"] = linear(k2, hid_dim, act_dim)
        params["wv"], params["bv"] = linear(k3, hid_dim, 1)
    else:
        params["w2"], params["b2"] = linear(k2, hid_dim, act_dim)
    return params


# ------------------------------- main -------------------------------------- #

if __name__ == "__main__":
    key = jax.random.PRNGKey(0)
    kx, kp = jax.random.split(key)

    batch = 2
    in_channels = 16
    act_dim = 4            # stand-in for act_space.n
    dueling = True

    x = jax.random.normal(kx, (batch, in_channels), dtype=jnp.float32)
    params = init_params(kp, in_channels, act_dim, dueling)

    out = dqn_forward(x, params, dueling=dueling)
    out = jax.block_until_ready(out)
    assert out.shape == (batch, act_dim)

    # --- Check 1: the dueling fold is an exact f32 identity. ---
    h = jnp.maximum(x @ params["w1"] + params["b1"], 0.0)
    adv = h @ params["wa"] + params["ba"]
    val = h @ params["wv"] + params["bv"]
    ref_f32 = val + adv - jnp.mean(adv, axis=-1, keepdims=True)
    w_eff, b_eff = fold_dueling_params(params)
    assert jnp.allclose(h @ w_eff + b_eff, ref_f32, atol=1e-5, rtol=1e-5)

    # --- Check 2: kernel vs a reference mirroring its bf16-operand numerics. ---
    def c(a):
        return a.astype(jnp.bfloat16).astype(jnp.float32)
    hp = jax.lax.Precision.HIGHEST
    h_r = jnp.maximum(
        jnp.dot(c(x), c(params["w1"]), precision=hp) + params["b1"], 0.0)
    ref_bf16 = jnp.dot(c(h_r), c(w_eff), precision=hp) + b_eff
    assert jnp.allclose(out, ref_bf16, atol=1e-3, rtol=1e-3)

    # --- Check 3: against the pure-f32 reference at bf16-level tolerance. ---
    assert jnp.allclose(out, ref_f32, atol=3e-2, rtol=3e-2)

    # --- Also exercise the non-dueling path with the same fused kernel. ---
    params_nd = init_params(kp, in_channels, act_dim, dueling=False)
    out_nd = jax.block_until_ready(
        dqn_forward(x, params_nd, dueling=False))
    ref_nd = jnp.maximum(x @ params_nd["w1"] + params_nd["b1"], 0.0)
    ref_nd = ref_nd @ params_nd["w2"] + params_nd["b2"]
    assert out_nd.shape == (batch, act_dim)
    assert jnp.allclose(out_nd, ref_nd, atol=3e-2, rtol=3e-2)

    print("KERNEL_OK")
</pallas_src>

<mosaic_0001>
module attributes {stable_mosaic.version = 11 : i64} {
  func.func @_dqn_fused_kernel(%arg0: i32, %arg1: memref<8x16xbf16, #tpu.memory_space<vmem>>, %arg2: memref<16x128xbf16, #tpu.memory_space<vmem>>, %arg3: memref<1x128xf32, #tpu.memory_space<vmem>>, %arg4: memref<128x128xbf16, #tpu.memory_space<vmem>>, %arg5: memref<1x128xf32, #tpu.memory_space<vmem>>, %arg6: memref<8x128xf32, #tpu.memory_space<vmem>>) attributes {dimension_semantics = [#tpu.dimension_semantics<parallel>], iteration_bounds = array<i64: 1>, scalar_prefetch = 0 : i64, scratch_operands = 0 : i64, tpu.core_type = #tpu.core_type<tc>, window_params = [{transform_indices = @transform_0, window_bounds = array<i64: 8, 16>}, {pipeline_mode = #tpu.pipeline_mode<synchronous>, transform_indices = @transform_1, window_bounds = array<i64: 16, 128>}, {pipeline_mode = #tpu.pipeline_mode<synchronous>, transform_indices = @transform_2, window_bounds = array<i64: 1, 128>}, {pipeline_mode = #tpu.pipeline_mode<synchronous>, transform_indices = @transform_3, window_bounds = array<i64: 128, 128>}, {pipeline_mode = #tpu.pipeline_mode<synchronous>, transform_indices = @transform_4, window_bounds = array<i64: 1, 128>}, {transform_indices = @transform_5, window_bounds = array<i64: 8, 128>}]} {
    %c0 = arith.constant 0 : index
    %c0_0 = arith.constant 0 : index
    %0 = vector.load %arg1[%c0, %c0_0] : memref<8x16xbf16, #tpu.memory_space<vmem>>, vector<8x16xbf16>
    %c0_1 = arith.constant 0 : index
    %c0_2 = arith.constant 0 : index
    %1 = vector.load %arg2[%c0_1, %c0_2] : memref<16x128xbf16, #tpu.memory_space<vmem>>, vector<16x128xbf16>
    %cst = arith.constant dense<0.000000e+00> : vector<8x128xf32>
    %2 = tpu.matmul %0, %1, %cst {dimension_numbers = #tpu.dot_dimension_numbers<[1], [0], [0], [1], [0, 0, 1, 1], [], []>} : vector<8x16xbf16>, vector<16x128xbf16>, vector<8x128xf32> -> vector<8x128xf32>
    %c0_3 = arith.constant 0 : index
    %c0_4 = arith.constant 0 : index
    %3 = vector.load %arg3[%c0_3, %c0_4] : memref<1x128xf32, #tpu.memory_space<vmem>>, vector<1x128xf32>
    %4 = vector.broadcast %3 : vector<1x128xf32> to vector<8x128xf32>
    %5 = arith.addf %2, %4 : vector<8x128xf32>
    %cst_5 = arith.constant 0.000000e+00 : f32
    %6 = vector.broadcast %cst_5 : f32 to vector<8x128xf32>
    %7 = arith.maximumf %5, %6 : vector<8x128xf32>
    %8 = arith.truncf %7 : vector<8x128xf32> to vector<8x128xbf16>
    %c0_6 = arith.constant 0 : index
    %c0_7 = arith.constant 0 : index
    %9 = vector.load %arg4[%c0_6, %c0_7] : memref<128x128xbf16, #tpu.memory_space<vmem>>, vector<128x128xbf16>
    %cst_8 = arith.constant dense<0.000000e+00> : vector<8x128xf32>
    %10 = tpu.matmul %8, %9, %cst_8 {dimension_numbers = #tpu.dot_dimension_numbers<[1], [0], [0], [1], [0, 0, 1, 1], [], []>} : vector<8x128xbf16>, vector<128x128xbf16>, vector<8x128xf32> -> vector<8x128xf32>
    %c0_9 = arith.constant 0 : index
    %c0_10 = arith.constant 0 : index
    %11 = vector.load %arg5[%c0_9, %c0_10] : memref<1x128xf32, #tpu.memory_space<vmem>>, vector<1x128xf32>
    %12 = vector.broadcast %11 : vector<1x128xf32> to vector<8x128xf32>
    %13 = arith.addf %10, %12 : vector<8x128xf32>
    %c0_11 = arith.constant 0 : index
    %c0_12 = arith.constant 0 : index
    %14 = vector.load %arg6[%c0_11, %c0_12] : memref<8x128xf32, #tpu.memory_space<vmem>>, vector<8x128xf32>
    tpu.vector_store %arg6[%c0_11, %c0_12], %13 {strides = array<i32>} : memref<8x128xf32, #tpu.memory_space<vmem>>, vector<8x128xf32>,
    return
  }
  func.func @transform_0(%arg0: i32) -> (i32, i32) {
    %c0_i32 = arith.constant 0 : i32
    %c0_i32_0 = arith.constant 0 : i32
    return %arg0, %c0_i32 : i32, i32
  }
  func.func @transform_1(%arg0: i32) -> (i32, i32) {
    %c0_i32 = arith.constant 0 : i32
    %c0_i32_0 = arith.constant 0 : i32
    %c0_i32_1 = arith.constant 0 : i32
    return %c0_i32, %c0_i32_0 : i32, i32
  }
  func.func @transform_2(%arg0: i32) -> (i32, i32) {
    %c0_i32 = arith.constant 0 : i32
    %c0_i32_0 = arith.constant 0 : i32
    %c0_i32_1 = arith.constant 0 : i32
    return %c0_i32, %c0_i32_0 : i32, i32
  }
  func.func @transform_3(%arg0: i32) -> (i32, i32) {
    %c0_i32 = arith.constant 0 : i32
    %c0_i32_0 = arith.constant 0 : i32
    %c0_i32_1 = arith.constant 0 : i32
    return %c0_i32, %c0_i32_0 : i32, i32
  }
  func.func @transform_4(%arg0: i32) -> (i32, i32) {
    %c0_i32 = arith.constant 0 : i32
    %c0_i32_0 = arith.constant 0 : i32
    %c0_i32_1 = arith.constant 0 : i32
    return %c0_i32, %c0_i32_0 : i32, i32
  }
  func.func @transform_5(%arg0: i32) -> (i32, i32) {
    %c0_i32 = arith.constant 0 : i32
    %c0_i32_0 = arith.constant 0 : i32
    return %arg0, %c0_i32 : i32, i32
  }
}

</mosaic_0001>

<bundles_post_ra>
// kernel: dqn_forward.1
= control target key start
LH: loop header
LB: loop body
LE: loop exit
PB: predicated region body
PF: predicated region fallthrough
CT: control target
= control target key end

     0   :  { %v259_v0 = vmov 0.0   ;;  %vm260_vm0 = vmmov 0   ;;  %vm37_vm1 = vcmask 130048   ;;  %s330_s1 = inlined_call_operand.vmem [shape: bf16[16,128], index: 1, kind: input, shape index: {}]   ;;  %s331_s0 = inlined_call_operand.vmem [shape: bf16[8,16], index: 0, kind: input, shape index: {}]   ;;  %s332_s3 = inlined_call_operand.vmem [shape: bf16[128,128], index: 3, kind: input, shape index: {}]   ;;  %s333_s2 = inlined_call_operand.vmem [shape: f32[1,128], index: 2, kind: input, shape index: {}]   ;;  %s334_s4 = inlined_call_operand.vmem [shape: f32[1,128], index: 4, kind: input, shape index: {}]   ;;  %s335_s5 = inlined_call_operand.vmem [shape: f32[8,128], index: 5, kind: output, shape index: {}]  }
   0x1   :  { %222 = vmatprep.subr.bf16.mxu0 %v259_v0  ;;  %v250_v1 = vld [vmem:[%s330_s1] sm:$0xff]   ;;  %224 = vmatprep.mubr.msk.bf16.mxu0 %vm260_vm0, %v259_v0  ;;  %v251_v3 = vld [vmem:[%s332_s3 + $0x38] sm:$0xff]   ;;  %v252_v4 = vld [vmem:[%s332_s3 + $0x30] sm:$0xff]  }
   0x2   :  { %v21_v2 = vld [vmem:[%s331_s0] sm:$0xf]  ;;  %228 = vmatprep.subr.bf16.mxu1 %v259_v0  ;;  %244 = vmatprep.mubr.msk.bf16.mxu1 %vm260_vm0, %v259_v0  ;;  %v253_v5 = vld [vmem:[%s332_s3 + $0x28] sm:$0xff]   ;;  %v255_v7 = vld [vmem:[%s332_s3 + $0x18] sm:$0xff]  }
   0x3   :  { %223 = vmatpush3.bf16.msra.mxu0 %v250_v1  ;;  %229 = vmatpush3.bf16.msra.mxu1 %v251_v3  ;;  %v254_v6 = vld [vmem:[%s332_s3 + $0x20] sm:$0xff]   ;;  %v256_v8 = vld [vmem:[%s332_s3 + $0x10] sm:$0xff]   ;;  %v257_v9 = vld [vmem:[%s332_s3 + $0x8] sm:$0xff]  }
   0x4   :  { %230 = vmatprep.subr.bf16.mxu1 %v259_v0  ;;  %v258_v10 = vld [vmem:[%s332_s3] sm:$0xff]  }
   0x5   :  { %v199_v11 = vld [vmem:[%s333_s2] ss:$0 sm:$0xff] }
   0x6   :  { %225 = vmatmul.mubr.msk.bf16.vlgmr.msra.gmra.mxu0 %vm37_vm1, %v21_v2  ;;  %v202_v19 = vld [vmem:[%s334_s4] ss:$0 sm:$0xff] }
   0x7   :  { %231 = vmatpush3.bf16.msra.mxu1 %v252_v4 }
   0x8   :  { %232 = vmatprep.subr.bf16.mxu1 %v259_v0 }
   0xb   :  { %233 = vmatpush3.bf16.msra.mxu1 %v253_v5 }
   0xc   :  { %234 = vmatprep.subr.bf16.mxu1 %v259_v0 }
   0xf   :  { %235 = vmatpush3.bf16.msra.mxu1 %v254_v6 }
  0x10   :  { %236 = vmatprep.subr.bf16.mxu1 %v259_v0 }
  0x13   :  { %237 = vmatpush3.bf16.msra.mxu1 %v255_v7 }
  0x14   :  { %238 = vmatprep.subr.bf16.mxu1 %v259_v0 }
  0x17   :  { %239 = vmatpush3.bf16.msra.mxu1 %v256_v8 }
  0x18   :  { %240 = vmatprep.subr.bf16.mxu1 %v259_v0 }
  0x1b   :  { %241 = vmatpush3.bf16.msra.mxu1 %v257_v9 }
  0x1c   :  { %242 = vmatprep.subr.bf16.mxu1 %v259_v0 }
  0x1f   :  { %243 = vmatpush3.bf16.msra.mxu1 %v258_v10 }
  0xc6   :  { %v75_v12 = vpop.f32.mrf.mxu0 }
  0xc7   :  { %v76_v13 = vadd.f32 %v199_v11, %v75_v12 }
  0xc8   :  { %v226_v14 = vpop.f32.mrf.mxu0 }
  0xc9   :  { %v81_v15 = vmax.f32 %v76_v13, 0.0 }
  0xca   :  { %v78_v16 = vpop.f32.mrf.mxu0 }
  0xcb   :  { %v82_v17 = vpack.c.bf16 %v81_v15, %v81_v15 }
  0xcc   :  { %v227_v18 = vpop.f32.mrf.mxu0 }
  0xcd   :  { %245 = vmatmul.mubr.bf16.vlgmr.msra.gmra.mxu1 %v82_v17 }
 0x18d   :  { %v188_v20 = vpop.f32.mrf.mxu1 }
 0x18e   :  { %v189_v21 = vadd.f32 %v202_v19, %v188_v20 }
 0x18f   :  { %v246_v22 = vpop.f32.mrf.mxu1 }
 0x190   :  { %194 = vst [vmem:[%s335_s5] sm:$0xff] %v189_v21 }
 0x191   :  { %v191_v23 = vpop.f32.mrf.mxu1 }
 0x193   :  { %v247_v24 = vpop.f32.mrf.mxu1 }

</bundles_post_ra>
